<compile_context>
chip_gen: v7x
topology: tpu7x:2x2x1
jax: 0.10.0
libtpu: 0.0.40
codegen_flags: <defaults>
</compile_context>

<pallas_src>
import math

import jax
import jax.numpy as jnp
from jax.experimental import pallas as pl
from jax.experimental.pallas import tpu as pltpu

_LANES = 128
# Total VMEM requested by the pipeline (all double-buffered blocks, padding
# accounted for).  <= ~24 MiB fits v7x's 32 MiB scoped default with headroom;
# v5e/v6e have far more VMEM so no per-chip retuning is needed.
_DEFAULT_TILE_BUDGET_BYTES = 24 * 1024 * 1024
_VMEM_LIMIT_BYTES = 32 * 1024 * 1024


def _round_up(v: int, m: int) -> int:
    return ((v + m - 1) // m) * m


def _sublanes(dtype) -> int:
    # Native VMEM tile is (8,128) f32 / (16,128) bf16 / (32,128) int8.
    return max(8, 32 // jnp.dtype(dtype).itemsize)


def make_positional_encoding(emb: int, max_len: int = 3000) -> jnp.ndarray:
    """Reproduces the torch buffer `pe` of shape (1, max_len, emb_tensor), f32."""
    emb_tensor = emb if emb % 2 == 0 else emb + 1
    position = jnp.arange(0, max_len, dtype=jnp.float32)[:, None]           # (max_len, 1)
    div_term = jnp.exp(
        jnp.arange(0, emb_tensor, 2, dtype=jnp.float32)
        * (-math.log(10000.0) / emb_tensor))                                 # (emb_tensor//2,)
    pe = jnp.zeros((max_len, emb_tensor), dtype=jnp.float32)
    pe = pe.at[:, 0::2].set(jnp.sin(position * div_term))
    pe = pe.at[:, 1::2].set(jnp.cos(position * div_term))
    return pe[None, :, :]


def prepare_positional_encoding(pe: jnp.ndarray, emb: int,
                                dtype=jnp.float32) -> jnp.ndarray:
    """One-time (init) prep: drop the odd-emb pad column, cast to the model
    dtype, flatten (max_len, emb) row-major and zero-pad to a 128 multiple.
    pe_flat[0, s*emb + e] == pe[0, s, e], so the kernel only touches the first
    n*emb lanes at call time -- no per-call slice/cast HBM pass."""
    max_len = pe.shape[1]
    flat = pe[0, :, :emb].astype(dtype).reshape(max_len * emb)
    padded = _round_up(max_len * emb, _LANES)
    flat = jnp.pad(flat, (0, padded - max_len * emb))
    return flat.reshape(1, padded)


def _pe_add_kernel(x_ref, pe_ref, o_ref):
    # x/o blocks: (bs, TL) or (bs, TS, 128).  pe block has leading 1 and
    # broadcasts over batch -- DMA'd once per tile, never once per batch row.
    o_ref[...] = x_ref[...] + pe_ref[...]


def _choose_tile(length: int, align: int, max_tile: int, min_tiles: int) -> int:
    """Largest aligned tile <= max_tile covering `length`, with >= min_tiles steps."""
    t = min(length, max(align, max_tile))
    if min_tiles > 1:
        t = min(t, pl.cdiv(length, min_tiles))
    if t >= length:
        # Single (possibly partial) block: round up to alignment; Pallas clamps
        # the boundary DMA and masks the boundary store.
        return _round_up(length, align)
    return max(align, (t // align) * align)


def positional_encoding_forward(x: jnp.ndarray, pe_flat: jnp.ndarray, *,
                                max_len: int,
                                tile_budget_bytes: int = _DEFAULT_TILE_BUDGET_BYTES,
                                vmem_limit_bytes: int = _VMEM_LIMIT_BYTES,
                                donate_x: bool = False) -> jnp.ndarray:
    """x: (bs, n, emb). pe_flat: prepared (1, round_up(max_len*emb,128)) buffer."""
    bs, n, emb = x.shape
    if n > max_len:
        raise ValueError(f"sequence length {n} exceeds positional-encoding max_len {max_len}")
    if pe_flat.shape != (1, _round_up(max_len * emb, _LANES)):
        raise ValueError("pe_flat was prepared for a different (emb, max_len)")

    # NOTE: like most TPU stacks (and unlike torch, which promotes to f32),
    # the add runs in x.dtype; ~1 ulp difference for bf16 models.
    pe_use = pe_flat if pe_flat.dtype == x.dtype else pe_flat.astype(x.dtype)

    itemsize = jnp.dtype(x.dtype).itemsize
    sub = _sublanes(x.dtype)
    flat = n * emb

    # v7x: >= 4 tiles on the single "parallel" axis keeps both TensorCores busy
    # and preserves pipelining; harmless on single-TC v5e/v6e.
    min_tiles = 4 if bs * flat * itemsize > 2 * 1024 * 1024 else 1

    params = pltpu.CompilerParams(dimension_semantics=("parallel",),
                                  vmem_limit_bytes=vmem_limit_bytes)
    extra = {"input_output_aliases": {0: 0}} if donate_x else {}

    if flat % _LANES == 0 and bs % sub != 0:
        # ---- Sublane-dense 3-D layout (small / unaligned batch) ----
        rows = flat // _LANES
        # 2x x + 2x out + 2x pe buffers; TS is a multiple of `sub`, so no padding.
        per_row_bytes = (4 * bs + 2) * _LANES * itemsize
        ts = _choose_tile(rows, sub, tile_budget_bytes // per_row_bytes, min_tiles)
        n_tiles = pl.cdiv(rows, ts)
        x3 = x.reshape(bs, rows, _LANES)
        pe3 = pe_use.reshape(1, pe_use.shape[1] // _LANES, _LANES)
        out = pl.pallas_call(
            _pe_add_kernel,
            out_shape=jax.ShapeDtypeStruct((bs, rows, _LANES), x.dtype),
            grid_spec=pltpu.PrefetchScalarGridSpec(
                num_scalar_prefetch=0,
                grid=(n_tiles,),
                in_specs=[pl.BlockSpec((bs, ts, _LANES), lambda t: (0, t, 0)),
                          pl.BlockSpec((1, ts, _LANES), lambda t: (0, t, 0))],
                out_specs=pl.BlockSpec((bs, ts, _LANES), lambda t: (0, t, 0)),
            ),
            compiler_params=params,
            **extra,
        )(x3, pe3)
        return out.reshape(bs, n, emb)

    # ---- Lane-dense 2-D layout ----
    # Padded-block accounting: x/out blocks pad bs up to `sub` sublanes, the
    # (1, tl) pe block occupies a full sublane tile.  All double-buffered.
    per_lane_bytes = (4 * _round_up(bs, sub) + 2 * sub) * itemsize
    tl = _choose_tile(flat, _LANES, tile_budget_bytes // per_lane_bytes, min_tiles)
    n_tiles = pl.cdiv(flat, tl)
    x2 = x.reshape(bs, flat)
    out = pl.pallas_call(
        _pe_add_kernel,
        out_shape=jax.ShapeDtypeStruct((bs, flat), x.dtype),
        grid_spec=pltpu.PrefetchScalarGridSpec(
            num_scalar_prefetch=0,
            grid=(n_tiles,),
            in_specs=[pl.BlockSpec((bs, tl), lambda t: (0, t)),
                      pl.BlockSpec((1, tl), lambda t: (0, t))],
            out_specs=pl.BlockSpec((bs, tl), lambda t: (0, t)),
        ),
        compiler_params=params,
        **extra,
    )(x2, pe_use)
    return out.reshape(bs, n, emb)


class PositionalEncoding:
    """Mirror of the torch module: builds the f32 `pe` buffer once and prepares
    the kernel operand once; __call__ is the Pallas forward."""

    def __init__(self, emb: int, max_len: int = 3000, dtype=jnp.float32):
        self.emb = emb
        self.max_len = max_len
        self.pe = make_positional_encoding(emb, max_len)          # (1, max_len, emb_tensor) f32
        self.pe_flat = prepare_positional_encoding(self.pe, emb, dtype)

    def __call__(self, x, **kwargs):
        return positional_encoding_forward(x, self.pe_flat, max_len=self.max_len, **kwargs)


if __name__ == "__main__":
    # Primary check: (bs, n, emb) = (2, 8, 32) -> sublane-dense 3-D path.
    bs, n, emb = 2, 8, 32
    mod = PositionalEncoding(emb, max_len=3000)
    x = jax.random.normal(jax.random.PRNGKey(0), (bs, n, emb), dtype=jnp.float32)
    out = jax.block_until_ready(mod(x))
    ref = x + mod.pe[:, :n, :emb]
    assert out.shape == (bs, n, emb)
    assert jnp.allclose(out, ref, atol=1e-6, rtol=1e-6)

    # Odd emb, flat not a multiple of 128 -> lane-dense 2-D path; tiny budget
    # forces a multi-tile grid with a partial (masked) final block.
    bs2, n2, emb2 = 3, 17, 33
    mod2 = PositionalEncoding(emb2, max_len=3000)
    x_b = jax.random.normal(jax.random.PRNGKey(0), (bs2, n2, emb2), dtype=jnp.float32)
    out_b = jax.block_until_ready(mod2(x_b, tile_budget_bytes=4 * 1024))
    ref_b = x_b + mod2.pe[:, :n2, :emb2]
    assert out_b.shape == (bs2, n2, emb2)
    assert jnp.allclose(out_b, ref_b, atol=1e-6, rtol=1e-6)

    # bf16 activations: pe prepared once in bf16 at init (no per-call cast pass).
    bs3, n3, emb3 = 2, 64, 64
    mod3 = PositionalEncoding(emb3, max_len=3000, dtype=jnp.bfloat16)
    x_c = jax.random.normal(jax.random.PRNGKey(0), (bs3, n3, emb3), dtype=jnp.bfloat16)
    out_c = jax.block_until_ready(mod3(x_c))
    ref_c = x_c.astype(jnp.float32) + mod3.pe[:, :n3, :emb3]
    assert jnp.allclose(out_c.astype(jnp.float32), ref_c, atol=5e-2, rtol=5e-2)

    print("KERNEL_OK")
</pallas_src>

<mosaic_0001>
module attributes {stable_mosaic.version = 11 : i64} {
  func.func @_pe_add_kernel(%arg0: i32, %arg1: memref<2x8x128xf32, #tpu.memory_space<vmem>>, %arg2: memref<1x8x128xf32, #tpu.memory_space<vmem>>, %arg3: memref<2x8x128xf32, #tpu.memory_space<vmem>>) attributes {dimension_semantics = [#tpu.dimension_semantics<parallel>], iteration_bounds = array<i64: 1>, scalar_prefetch = 0 : i64, scratch_operands = 0 : i64, tpu.core_type = #tpu.core_type<tc>, window_params = [{transform_indices = @transform_0, window_bounds = array<i64: 2, 8, 128>}, {transform_indices = @transform_1, window_bounds = array<i64: 1, 8, 128>}, {transform_indices = @transform_2, window_bounds = array<i64: 2, 8, 128>}]} {
    %c0 = arith.constant 0 : index
    %c0_0 = arith.constant 0 : index
    %c0_1 = arith.constant 0 : index
    %0 = vector.load %arg1[%c0, %c0_0, %c0_1] : memref<2x8x128xf32, #tpu.memory_space<vmem>>, vector<2x8x128xf32>
    %c0_2 = arith.constant 0 : index
    %c0_3 = arith.constant 0 : index
    %c0_4 = arith.constant 0 : index
    %1 = vector.load %arg2[%c0_2, %c0_3, %c0_4] : memref<1x8x128xf32, #tpu.memory_space<vmem>>, vector<1x8x128xf32>
    %2 = vector.broadcast %1 : vector<1x8x128xf32> to vector<2x8x128xf32>
    %3 = arith.addf %0, %2 : vector<2x8x128xf32>
    %c0_5 = arith.constant 0 : index
    %c0_6 = arith.constant 0 : index
    %c0_7 = arith.constant 0 : index
    %4 = vector.load %arg3[%c0_5, %c0_6, %c0_7] : memref<2x8x128xf32, #tpu.memory_space<vmem>>, vector<2x8x128xf32>
    tpu.vector_store %arg3[%c0_5, %c0_6, %c0_7], %3 {strides = array<i32>} : memref<2x8x128xf32, #tpu.memory_space<vmem>>, vector<2x8x128xf32>,
    return
  }
  func.func @transform_0(%arg0: i32) -> (i32, i32, i32) {
    %c0_i32 = arith.constant 0 : i32
    %c0_i32_0 = arith.constant 0 : i32
    %c0_i32_1 = arith.constant 0 : i32
    return %c0_i32, %arg0, %c0_i32_0 : i32, i32, i32
  }
  func.func @transform_1(%arg0: i32) -> (i32, i32, i32) {
    %c0_i32 = arith.constant 0 : i32
    %c0_i32_0 = arith.constant 0 : i32
    %c0_i32_1 = arith.constant 0 : i32
    return %c0_i32, %arg0, %c0_i32_0 : i32, i32, i32
  }
  func.func @transform_2(%arg0: i32) -> (i32, i32, i32) {
    %c0_i32 = arith.constant 0 : i32
    %c0_i32_0 = arith.constant 0 : i32
    %c0_i32_1 = arith.constant 0 : i32
    return %c0_i32, %arg0, %c0_i32_0 : i32, i32, i32
  }
}

</mosaic_0001>

<bundles_post_ra>
// kernel: tpu_custom_call.1
= control target key start
LH: loop header
LB: loop body
LE: loop exit
PB: predicated region body
PF: predicated region fallthrough
CT: control target
= control target key end

     0   :  { %7 = vsyncpa [#allocation4], 0  ;;  %s150_s0 = inlined_call_operand.vmem [shape: f32[2,2,128], index: 0, kind: input, shape index: {}]   ;;  %s151_s1 = inlined_call_operand.vmem [shape: f32[1,750,128], index: 1, kind: input, shape index: {}]   ;;  %s152_s2 = inlined_call_operand.hbm [shape: f32[2,2,128], index: 2, kind: output, shape index: {}]  }
   0x1   :  { %v25_v0 = vld [vmem:[%s150_s0] sm:$0x3]  ;;  %v27_v1 = vld [vmem:[%s150_s0 + $0x2] sm:$0x3] }
   0x2   :  { %26 = vst [vmem:[#allocation2] sm:$0x3] %v25_v0  ;;  %28 = vst [vmem:[#allocation2 + $0x8] sm:$0x3] %v27_v1  ;;  %v51_v2 = vld [vmem:[%s151_s1] sm:$0xff] }
   0x9   :  { %v49_v3 = vld [vmem:[#allocation2] sm:$0xff]  ;;  %v50_v4 = vld [vmem:[#allocation2 + $0x8] sm:$0xff] }
   0xa   :  { %v52_v5 = vadd.f32 %v51_v2, %v49_v3  ;;  %v53_v6 = vadd.f32 %v51_v2, %v50_v4 }
   0xc   :  { %54 = vst [vmem:[#allocation3] sm:$0xff] %v52_v5  ;;  %55 = vst [vmem:[#allocation3 + $0x8] sm:$0xff] %v53_v6 }
   0xd   :  { %60 = vsyncadd [#allocation4], 192  ;;  %s115_s15 = smov [#allocation3]   ;;  %s116_s17 = smov 128  }
   0xe   :  { %s77_s16 = sshll.u32 %s115_s15, 4  ;;  %84 = sst [smem:[#allocation6]] %s116_s17  ;;  %s78_s16 = int_to_ptr.vmem [resolvable:$true] %s77_s16 }
   0xf   :  { %s117_s18 = smov 32   ;;  %s118_s0 = smov 1  }
  0x10   :  { %86 = sst [smem:[#allocation6 + $0x1]] %s117_s18  ;;  %s119_s19 = smov 2  }
  0x11   :  { %88 = sst [smem:[#allocation6 + $0x2]] %s118_s0  ;;  %s120_s1 = smov [#allocation4]  }
  0x12   :  { %90 = sst [smem:[#allocation6 + $0x3]] %s117_s18  ;;  %s121_s20 = smov [#allocation5]  }
  0x13   :  { %92 = sst [smem:[#allocation6 + $0x4]] %s117_s18  ;;  %s122_s21 = smov 0  }
  0x14   :  { %94 = sst [smem:[#allocation6 + $0x5]] %s119_s19 }
  0x15   :  { %96 = dma.general %s78_s16, 64, %s152_s2, %s120_s1, %s121_s20, [#allocation6], %s122_s21, 0  }
  0x16   :  { %113 = dma.done.wait [#allocation4], 256  }
  0x17   :  { %114 = vsyncadd [#allocation4], 4294967040 }
  0x18   :  { %100 = vsyncpa [#allocation4], 1 }

</bundles_post_ra>
